<compile_context>
chip_gen: v6e
topology: v6e:2x2x1
jax: 0.10.0
libtpu: 0.0.40
codegen_flags: <defaults>
</compile_context>

<pallas_src>
import functools
import math

import jax
import jax.numpy as jnp
from jax.experimental import pallas as pl
from jax.experimental.pallas import tpu as pltpu


def _mh_loc_kernel(x_ref, w_ref, b_ref, o_ref):
    # x_ref: (tm, g*D), w_ref: (g*D, g*N), b_ref: (1, g*N), o_ref: (tm, g*N)
    acc = jnp.dot(x_ref[...], w_ref[...], preferred_element_type=jnp.float32)
    o_ref[...] = (acc + b_ref[...]).astype(o_ref.dtype)


@functools.partial(jax.jit, static_argnames=("num_hypothesis", "output_dim"))
def mh_localization_output(x, w_all, b_all, *, num_hypothesis, output_dim):
    """x: [B, T, D]; w_all: [D, K*output_dim]; b_all: [K*output_dim].

    Returns [B, T, K, output_dim] (matches torch.stack(dim=-2) of the K
    per-hypothesis Linear outputs).
    """
    B, T, D = x.shape
    M = B * T
    N = num_hypothesis * output_dim
    itemsize = jnp.dtype(x.dtype).itemsize

    # Lane fold: pack g consecutive rows into one 128-lane slab.  g must also
    # divide M so the wrapper reshape stays metadata-only (no pad/slice).
    if N < 128 and 128 % N == 0:
        g = math.gcd(128 // N, M)
    else:
        g = 1

    Dg, Ng = g * D, g * N
    M_fold = M // g

    # Block-diagonal weights / tiled bias (tiny; in practice precompute once).
    if g > 1:
        w_bd = jnp.kron(jnp.eye(g, dtype=w_all.dtype), w_all)   # [g*D, g*N]
        b_bd = jnp.tile(b_all, g).reshape(1, Ng)
    else:
        w_bd = w_all
        b_bd = b_all.reshape(1, Ng)

    x_fold = x.reshape(M_fold, Dg)    # metadata-only reshape

    # Row-tile size: ~32K original rows per step amortizes the ~0.35us
    # per-grid-step overhead; cap so double-buffered x+out blocks fit v5e's
    # 16 MiB default scoped VMEM (v6e: 32 MiB; v7x: 32 of 64 MiB physical).
    lane = 128
    x_row_b = pl.cdiv(Dg, lane) * lane * itemsize   # lane-padded VMEM bytes/row
    o_row_b = pl.cdiv(Ng, lane) * lane * itemsize
    vmem_budget = 12 * 1024 * 1024
    tm_cap = max(8, (vmem_budget // (2 * (x_row_b + o_row_b))) // 8 * 8)
    tm_target = max(8, (32768 // g) // 8 * 8)
    tm = min(tm_target, tm_cap)
    if M_fold <= tm:
        tm = M_fold               # single full-array block for small inputs
    grid = (pl.cdiv(M_fold, tm),)  # trailing partial tile -> masked out-writes

    cost = pl.CostEstimate(
        flops=2 * M_fold * Dg * Ng,
        transcendentals=0,
        bytes_accessed=(M_fold * Dg + M_fold * Ng + Dg * Ng + Ng) * itemsize,
    )

    out = pl.pallas_call(
        _mh_loc_kernel,
        out_shape=jax.ShapeDtypeStruct((M_fold, Ng), x.dtype),
        grid_spec=pltpu.PrefetchScalarGridSpec(
            num_scalar_prefetch=0,
            grid=grid,
            in_specs=[
                pl.BlockSpec((tm, Dg), lambda i: (i, 0)),    # x row tile
                pl.BlockSpec((Dg, Ng), lambda i: (0, 0)),    # W resident
                pl.BlockSpec((1, Ng), lambda i: (0, 0)),     # b resident
            ],
            out_specs=pl.BlockSpec((tm, Ng), lambda i: (i, 0)),
        ),
        compiler_params=pltpu.CompilerParams(
            dimension_semantics=("parallel",),
        ),
        cost_estimate=cost,
    )(x_fold, w_bd, b_bd)

    # [M//g, g*N] is row-major-identical to [M, N] == [B, T, K, output_dim].
    return out.reshape(B, T, num_hypothesis, output_dim)


def init_params(key, input_dim, num_hypothesis, output_dim=2, dtype=jnp.float32):
    """Deterministic synthetic parameters, one (W, b) per hypothesis,
    concatenated along the output axis: W_all [D, K*out], b_all [K*out]."""
    keys = jax.random.split(key, 2 * num_hypothesis)
    ws, bs = [], []
    bound = 1.0 / jnp.sqrt(input_dim)
    for k in range(num_hypothesis):
        wk = jax.random.uniform(
            keys[2 * k], (input_dim, output_dim), dtype, -bound, bound
        )
        bk = jax.random.uniform(
            keys[2 * k + 1], (output_dim,), dtype, -bound, bound
        )
        ws.append(wk)
        bs.append(bk)
    w_all = jnp.concatenate(ws, axis=1)          # [D, K*output_dim]
    b_all = jnp.concatenate(bs, axis=0)          # [K*output_dim]
    return w_all, b_all


if __name__ == "__main__":
    B, T, D = 2, 8, 32
    K, OUT = 4, 2

    key = jax.random.PRNGKey(0)
    kx, kp = jax.random.split(key)
    x = jax.random.normal(kx, (B, T, D), jnp.float32)
    w_all, b_all = init_params(kp, D, K, OUT)

    y = mh_localization_output(x, w_all, b_all, num_hypothesis=K, output_dim=OUT)
    y = jax.block_until_ready(y)

    # Pure-JAX reference: per-hypothesis linear, stacked on dim=-2.
    x2 = x.reshape(-1, D)
    refs = []
    for k in range(K):
        wk = w_all[:, k * OUT:(k + 1) * OUT]
        bk = b_all[k * OUT:(k + 1) * OUT]
        refs.append((x2 @ wk + bk).reshape(B, T, OUT))
    ref = jnp.stack(refs, axis=-2)

    assert y.shape == (B, T, K, OUT), y.shape
    assert jnp.allclose(y, ref, atol=1e-5, rtol=1e-5), float(jnp.max(jnp.abs(y - ref)))

    print("KERNEL_OK")
</pallas_src>

<mosaic_0001>
module attributes {stable_mosaic.version = 11 : i64} {
  func.func @_mh_loc_kernel(%arg0: i32, %arg1: memref<1x512xf32, #tpu.memory_space<vmem>>, %arg2: memref<512x128xf32, #tpu.memory_space<vmem>>, %arg3: memref<1x128xf32, #tpu.memory_space<vmem>>, %arg4: memref<1x128xf32, #tpu.memory_space<vmem>>) attributes {dimension_semantics = [#tpu.dimension_semantics<parallel>], iteration_bounds = array<i64: 1>, scalar_prefetch = 0 : i64, scratch_operands = 0 : i64, tpu.core_type = #tpu.core_type<tc>, window_params = [{transform_indices = @transform_0, window_bounds = array<i64: 1, 512>}, {pipeline_mode = #tpu.pipeline_mode<synchronous>, transform_indices = @transform_1, window_bounds = array<i64: 512, 128>}, {pipeline_mode = #tpu.pipeline_mode<synchronous>, transform_indices = @transform_2, window_bounds = array<i64: 1, 128>}, {transform_indices = @transform_3, window_bounds = array<i64: 1, 128>}]} {
    %c0 = arith.constant 0 : index
    %c0_0 = arith.constant 0 : index
    %0 = vector.load %arg1[%c0, %c0_0] : memref<1x512xf32, #tpu.memory_space<vmem>>, vector<1x512xf32>
    %c0_1 = arith.constant 0 : index
    %c0_2 = arith.constant 0 : index
    %1 = vector.load %arg2[%c0_1, %c0_2] : memref<512x128xf32, #tpu.memory_space<vmem>>, vector<512x128xf32>
    %cst = arith.constant dense<0.000000e+00> : vector<1x128xf32>
    %2 = tpu.matmul %0, %1, %cst {dimension_numbers = #tpu.dot_dimension_numbers<[1], [0], [0], [1], [0, 0, 1, 1], [], []>} : vector<1x512xf32>, vector<512x128xf32>, vector<1x128xf32> -> vector<1x128xf32>
    %c0_3 = arith.constant 0 : index
    %c0_4 = arith.constant 0 : index
    %3 = vector.load %arg3[%c0_3, %c0_4] : memref<1x128xf32, #tpu.memory_space<vmem>>, vector<1x128xf32>
    %4 = arith.addf %2, %3 : vector<1x128xf32>
    %c0_5 = arith.constant 0 : index
    %c0_6 = arith.constant 0 : index
    %5 = vector.load %arg4[%c0_5, %c0_6] : memref<1x128xf32, #tpu.memory_space<vmem>>, vector<1x128xf32>
    tpu.vector_store %arg4[%c0_5, %c0_6], %4 {strides = array<i32>} : memref<1x128xf32, #tpu.memory_space<vmem>>, vector<1x128xf32>,
    return
  }
  func.func @transform_0(%arg0: i32) -> (i32, i32) {
    %c0_i32 = arith.constant 0 : i32
    %c0_i32_0 = arith.constant 0 : i32
    return %arg0, %c0_i32 : i32, i32
  }
  func.func @transform_1(%arg0: i32) -> (i32, i32) {
    %c0_i32 = arith.constant 0 : i32
    %c0_i32_0 = arith.constant 0 : i32
    %c0_i32_1 = arith.constant 0 : i32
    return %c0_i32, %c0_i32_0 : i32, i32
  }
  func.func @transform_2(%arg0: i32) -> (i32, i32) {
    %c0_i32 = arith.constant 0 : i32
    %c0_i32_0 = arith.constant 0 : i32
    %c0_i32_1 = arith.constant 0 : i32
    return %c0_i32, %c0_i32_0 : i32, i32
  }
  func.func @transform_3(%arg0: i32) -> (i32, i32) {
    %c0_i32 = arith.constant 0 : i32
    %c0_i32_0 = arith.constant 0 : i32
    return %arg0, %c0_i32 : i32, i32
  }
}

</mosaic_0001>

<bundles_post_ra>
// kernel: tile.8
= control target key start
LH: loop header
LB: loop body
LE: loop exit
PB: predicated region body
PF: predicated region fallthrough
CT: control target
= control target key end

     0   :  { %s28_s0 = inlined_call_operand.vmem [shape: f32[8], index: 0, kind: input, shape index: {}]   ;;  %s29_s1 = inlined_call_operand.vmem [shape: f32[16,8], index: 1, kind: output, shape index: {}]  }
   0x1   :  { %v4_v0 = vld [vmem:[%s28_s0] ss:$0 sm:$0xff] }
   0x2   :  { %5 = vst [vmem:[%s29_s1] sm:$0xff] %v4_v0  ;;  %8 = vst [vmem:[%s29_s1 + $0x8] sm:$0xff] %v4_v0 }

// kernel: tile.9
= control target key start
LH: loop header
LB: loop body
LE: loop exit
PB: predicated region body
PF: predicated region fallthrough
CT: control target
= control target key end

     0   :  { %s133_s10 = smov 120   ;;  %s134_s11 = smov 104   ;;  %vm3_vm0 = vcmask 64512   ;;  %vm9_vm1 = vcmask 1048512   ;;  %vm15_vm2 = vcmask 982912   ;;  %vm21_vm3 = vcmask 917312   ;;  %s209_s0 = inlined_call_operand.vmem [shape: f32[16,8], index: 0, kind: input, shape index: {}]   ;;  %s210_s1 = inlined_call_operand.vmem [shape: f32[1,128], index: 1, kind: output, shape index: {}]  }
   0x1   :  { %v103_v0 = vld [vmem:[%s209_s0 + $0xf] sm:$0x1]   ;;  %v105_v1 = vld [vmem:[%s209_s0 + $0xd] sm:$0x1]   ;;  %v104_v2 = vld [vmem:[%s209_s0 + $0xe] sm:$0x1]  }
   0x2   :  { %7 = vrot.lane.b32.xlu0 %v103_v0, %s133_s10  ;;  %19 = vrot.lane.b32.xlu1 %v105_v1, %s134_s11  ;;  %v106_v3 = vld [vmem:[%s209_s0 + $0xc] sm:$0x1]   ;;  %s135_s16 = smov 112   ;;  %s136_s17 = smov 96   ;;  %v107_v4 = vld [vmem:[%s209_s0 + $0xb] sm:$0x1]  }
   0x3   :  { %v108_v5 = vld [vmem:[%s209_s0 + $0xa] sm:$0x1]   ;;  %v2_v6 = vld [vmem:[%s209_s0] sm:$0x1]   ;;  %s137_s24 = smov 88   ;;  %s138_s25 = smov 80  }
   0x4   :  { %4 = vst.msk [vmem:[#allocation0] sm:$0x1] %vm3_vm0, %v2_v6   ;;  %v109_v7 = vld [vmem:[%s209_s0 + $0x9] sm:$0x1]   ;;  %v110_v8 = vld [vmem:[%s209_s0 + $0x8] sm:$0x1]  }
   0x5   :  { %s139_s30 = smov 72   ;;  %s140_s2 = smov 64   ;;  %v111_v9 = vld [vmem:[%s209_s0 + $0x7] sm:$0x1]   ;;  %v112_v10 = vld [vmem:[%s209_s0 + $0x6] sm:$0x1]  }
   0x6   :  { %13 = vrot.lane.b32.xlu0 %v104_v2, %s135_s16  ;;  %25 = vrot.lane.b32.xlu1 %v106_v3, %s136_s17  ;;  %s141_s7 = smov 56   ;;  %s142_s8 = smov 48   ;;  %v113_v11 = vld [vmem:[%s209_s0 + $0x5] sm:$0x1]   ;;  %v114_v12 = vld [vmem:[%s209_s0 + $0x4] sm:$0x1]  }
   0x7   :  { %s143_s13 = smov 40   ;;  %s144_s14 = smov 32   ;;  %v115_v13 = vld [vmem:[%s209_s0 + $0x3] sm:$0x1]   ;;  %v116_v14 = vld [vmem:[%s209_s0 + $0x2] sm:$0x1]  }
   0x8   :  { %s145_s19 = smov 24   ;;  %s146_s20 = smov 16   ;;  %v117_v15 = vld [vmem:[%s209_s0 + $0x1] sm:$0x1]   ;;  %vm27_vm4 = vcmask 851712   ;;  %vm33_vm5 = vcmask 786112  }
   0x9   :  { %s147_s0 = smov 8   ;;  %vm39_vm6 = vcmask 720512   ;;  %vm45_vm7 = vcmask 654912   ;;  %vm51_vm8 = vcmask 589312   ;;  %vm57_vm9 = vcmask 523712  }
   0xa   :  { %31 = vrot.lane.b32.xlu0 %v107_v4, %s137_s24  ;;  %37 = vrot.lane.b32.xlu1 %v108_v5, %s138_s25  ;;  %vm63_vm10 = vcmask 458112   ;;  %vm69_vm11 = vcmask 392512   ;;  %vm75_vm12 = vcmask 326912   ;;  %vm81_vm13 = vcmask 261312  }
   0xb   :  { %vm87_vm14 = vcmask 195712   ;;  %vm93_vm15 = vcmask 130112  }
   0xe   :  { %43 = vrot.lane.b32.xlu0 %v109_v7, %s139_s30  ;;  %49 = vrot.lane.b32.xlu1 %v110_v8, %s140_s2 }
  0x12   :  { %55 = vrot.lane.b32.xlu0 %v111_v9, %s141_s7  ;;  %61 = vrot.lane.b32.xlu1 %v112_v10, %s142_s8 }
  0x16   :  { %67 = vrot.lane.b32.xlu0 %v113_v11, %s143_s13  ;;  %73 = vrot.lane.b32.xlu1 %v114_v12, %s144_s14 }
  0x1a   :  { %79 = vrot.lane.b32.xlu0 %v115_v13, %s145_s19  ;;  %85 = vrot.lane.b32.xlu1 %v116_v14, %s146_s20 }
  0x1e   :  { %91 = vrot.lane.b32.xlu0 %v117_v15, %s147_s0 }
  0x74   :  { %v8_v16 = vpop.permute.xlu0 %7   ;;  %v20_v17 = vpop.permute.xlu1 %19  }
  0x75   :  { %10 = vst.msk [vmem:[#allocation0] sm:$0x1] %vm9_vm1, %v8_v16  }
  0x78   :  { %v14_v18 = vpop.permute.xlu0 %13   ;;  %v26_v19 = vpop.permute.xlu1 %25  }
  0x79   :  { %16 = vst.msk [vmem:[#allocation0] sm:$0x1] %vm15_vm2, %v14_v18  }
  0x7a   :  { %22 = vst.msk [vmem:[#allocation0] sm:$0x1] %vm21_vm3, %v20_v17  }
  0x7b   :  { %28 = vst.msk [vmem:[#allocation0] sm:$0x1] %vm27_vm4, %v26_v19  }
  0x7c   :  { %v32_v20 = vpop.permute.xlu0 %31   ;;  %v38_v21 = vpop.permute.xlu1 %37  }
  0x7d   :  { %34 = vst.msk [vmem:[#allocation0] sm:$0x1] %vm33_vm5, %v32_v20  }
  0x7e   :  { %40 = vst.msk [vmem:[#allocation0] sm:$0x1] %vm39_vm6, %v38_v21  }
  0x80   :  { %v44_v22 = vpop.permute.xlu0 %43   ;;  %v50_v23 = vpop.permute.xlu1 %49  }
  0x81   :  { %46 = vst.msk [vmem:[#allocation0] sm:$0x1] %vm45_vm7, %v44_v22  }
  0x82   :  { %52 = vst.msk [vmem:[#allocation0] sm:$0x1] %vm51_vm8, %v50_v23  }
  0x84   :  { %v56_v24 = vpop.permute.xlu0 %55   ;;  %v62_v25 = vpop.permute.xlu1 %61  }
  0x85   :  { %58 = vst.msk [vmem:[#allocation0] sm:$0x1] %vm57_vm9, %v56_v24  }
  0x86   :  { %64 = vst.msk [vmem:[#allocation0] sm:$0x1] %vm63_vm10, %v62_v25  }
  0x88   :  { %v68_v26 = vpop.permute.xlu0 %67   ;;  %v74_v27 = vpop.permute.xlu1 %73  }
  0x89   :  { %70 = vst.msk [vmem:[#allocation0] sm:$0x1] %vm69_vm11, %v68_v26  }
  0x8a   :  { %76 = vst.msk [vmem:[#allocation0] sm:$0x1] %vm75_vm12, %v74_v27  }
  0x8c   :  { %v80_v28 = vpop.permute.xlu0 %79   ;;  %v86_v29 = vpop.permute.xlu1 %85  }
  0x8d   :  { %82 = vst.msk [vmem:[#allocation0] sm:$0x1] %vm81_vm13, %v80_v28  }
  0x8e   :  { %88 = vst.msk [vmem:[#allocation0] sm:$0x1] %vm87_vm14, %v86_v29  }
  0x90   :  { %v92_v30 = vpop.permute.xlu0 %91  }
  0x91   :  { %94 = vst.msk [vmem:[#allocation0] sm:$0x1] %vm93_vm15, %v92_v30  }
  0x98   :  { %v99_v31 = vld [vmem:[#allocation0] sm:$0x1] }
  0x99   :  { %102 = vst [vmem:[%s210_s1] sm:$0x1] %v99_v31 }

// kernel: mh_localization_output.1
= control target key start
LH: loop header
LB: loop body
LE: loop exit
PB: predicated region body
PF: predicated region fallthrough
CT: control target
= control target key end

     0   :  { %v81_v38 = vlaneseq  ;;  %s537_s1 = inlined_call_operand.vmem [shape: f32[512,128], index: 1, kind: input, shape index: {}]   ;;  %s538_s0 = inlined_call_operand.vmem [shape: f32[1,512], index: 0, kind: input, shape index: {}]   ;;  %s539_s2 = inlined_call_operand.vmem [shape: f32[1,128], index: 2, kind: input, shape index: {}]   ;;  %s540_s3 = inlined_call_operand.vmem [shape: f32[1,128], index: 3, kind: output, shape index: {}]  }
   0x1   :  { %v46_v0 = vld [vmem:[%s537_s1 + $0xf8] sm:$0xff]  ;;  %v45_v4 = vld [vmem:[%s537_s1 + $0xf0] sm:$0xff]  ;;  %v44_v8 = vld [vmem:[%s537_s1 + $0xe8] sm:$0xff] }
   0x2   :  { %v78_v1 = vld [vmem:[%s537_s1 + $0x1f8] sm:$0xff]  ;;  %246 = vmatprep.subr.mxu0 %v46_v0  ;;  %v77_v5 = vld [vmem:[%s537_s1 + $0x1f0] sm:$0xff]  ;;  %v76_v9 = vld [vmem:[%s537_s1 + $0x1e8] sm:$0xff]  ;;  %v82_v47 = vshrl.u32 %v81_v38, 7 }
   0x3   :  { %v30_v2 = vld [vmem:[%s537_s1 + $0x78] sm:$0xff]  ;;  %281 = vmatprep.subr.mxu1 %v78_v1  ;;  %v29_v6 = vld [vmem:[%s537_s1 + $0x70] sm:$0xff]  ;;  %v28_v10 = vld [vmem:[%s537_s1 + $0x68] sm:$0xff] }
   0x4   :  { %v62_v3 = vld [vmem:[%s537_s1 + $0x178] sm:$0xff]  ;;  %247 = vmatpush3.msra.mxu0 %v30_v2  ;;  %v61_v7 = vld [vmem:[%s537_s1 + $0x170] sm:$0xff]  ;;  %v60_v11 = vld [vmem:[%s537_s1 + $0x168] sm:$0xff]  ;;  %v87_v56 = vsub.s32 1, %v82_v47  ;;  %v95_v60 = vsub.s32 3, %v82_v47  ;;  %v83_v63 = vsub.s32 0, %v82_v47 }
   0x5   :  { %282 = vmatpush3.msra.mxu1 %v62_v3  ;;  %248 = vmatprep.subr.mxu0 %v45_v4  ;;  %v43_v12 = vld [vmem:[%s537_s1 + $0xe0] sm:$0xff]  ;;  %v42_v16 = vld [vmem:[%s537_s1 + $0xd8] sm:$0xff]  ;;  %v41_v20 = vld [vmem:[%s537_s1 + $0xd0] sm:$0xff]  ;;  %v91_v0 = vsub.s32 2, %v82_v47 }
   0x6   :  { %283 = vmatprep.subr.mxu1 %v77_v5  ;;  %249 = vmatpush3.msra.mxu0 %v29_v6  ;;  %v75_v13 = vld [vmem:[%s537_s1 + $0x1e0] sm:$0xff]  ;;  %v74_v17 = vld [vmem:[%s537_s1 + $0x1d8] sm:$0xff]  ;;  %v73_v21 = vld [vmem:[%s537_s1 + $0x1d0] sm:$0xff] }
   0x7   :  { %284 = vmatpush3.msra.mxu1 %v61_v7  ;;  %250 = vmatprep.subr.mxu0 %v44_v8  ;;  %v27_v14 = vld [vmem:[%s537_s1 + $0x60] sm:$0xff]  ;;  %v26_v18 = vld [vmem:[%s537_s1 + $0x58] sm:$0xff]  ;;  %v25_v22 = vld [vmem:[%s537_s1 + $0x50] sm:$0xff] }
   0x8   :  { %285 = vmatprep.subr.mxu1 %v76_v9  ;;  %v59_v15 = vld [vmem:[%s537_s1 + $0x160] sm:$0xff]  ;;  %251 = vmatpush3.msra.mxu0 %v28_v10  ;;  %v58_v19 = vld [vmem:[%s537_s1 + $0x158] sm:$0xff]  ;;  %v57_v23 = vld [vmem:[%s537_s1 + $0x150] sm:$0xff] }
   0x9   :  { %286 = vmatpush3.msra.mxu1 %v60_v11  ;;  %252 = vmatprep.subr.mxu0 %v43_v12  ;;  %v40_v24 = vld [vmem:[%s537_s1 + $0xc8] sm:$0xff]  ;;  %v39_v28 = vld [vmem:[%s537_s1 + $0xc0] sm:$0xff]  ;;  %v38_v32 = vld [vmem:[%s537_s1 + $0xb8] sm:$0xff] }
   0xa   :  { %287 = vmatprep.subr.mxu1 %v75_v13  ;;  %253 = vmatpush3.msra.mxu0 %v27_v14  ;;  %v72_v25 = vld [vmem:[%s537_s1 + $0x1c8] sm:$0xff]  ;;  %v71_v29 = vld [vmem:[%s537_s1 + $0x1c0] sm:$0xff]  ;;  %v70_v33 = vld [vmem:[%s537_s1 + $0x1b8] sm:$0xff] }
   0xb   :  { %288 = vmatpush3.msra.mxu1 %v59_v15  ;;  %254 = vmatprep.subr.mxu0 %v42_v16  ;;  %v24_v26 = vld [vmem:[%s537_s1 + $0x48] sm:$0xff]  ;;  %v23_v30 = vld [vmem:[%s537_s1 + $0x40] sm:$0xff]  ;;  %v22_v34 = vld [vmem:[%s537_s1 + $0x38] sm:$0xff] }
   0xc   :  { %289 = vmatprep.subr.mxu1 %v74_v17  ;;  %255 = vmatpush3.msra.mxu0 %v26_v18  ;;  %v56_v27 = vld [vmem:[%s537_s1 + $0x148] sm:$0xff]  ;;  %v55_v31 = vld [vmem:[%s537_s1 + $0x140] sm:$0xff]  ;;  %v54_v35 = vld [vmem:[%s537_s1 + $0x138] sm:$0xff] }
   0xd   :  { %290 = vmatpush3.msra.mxu1 %v58_v19  ;;  %256 = vmatprep.subr.mxu0 %v41_v20  ;;  %v37_v36 = vld [vmem:[%s537_s1 + $0xb0] sm:$0xff]  ;;  %v36_v41 = vld [vmem:[%s537_s1 + $0xa8] sm:$0xff]  ;;  %v35_v45 = vld [vmem:[%s537_s1 + $0xa0] sm:$0xff] }
   0xe   :  { %291 = vmatprep.subr.mxu1 %v73_v21  ;;  %257 = vmatpush3.msra.mxu0 %v25_v22  ;;  %v69_v37 = vld [vmem:[%s537_s1 + $0x1b0] sm:$0xff]  ;;  %v68_v42 = vld [vmem:[%s537_s1 + $0x1a8] sm:$0xff]  ;;  %v67_v46 = vld [vmem:[%s537_s1 + $0x1a0] sm:$0xff] }
   0xf   :  { %292 = vmatpush3.msra.mxu1 %v57_v23  ;;  %258 = vmatprep.subr.mxu0 %v40_v24  ;;  %v21_v39 = vld [vmem:[%s537_s1 + $0x30] sm:$0xff]  ;;  %v20_v43 = vld [vmem:[%s537_s1 + $0x28] sm:$0xff]  ;;  %v19_v48 = vld [vmem:[%s537_s1 + $0x20] sm:$0xff] }
  0x10   :  { %293 = vmatprep.subr.mxu1 %v72_v25  ;;  %259 = vmatpush3.msra.mxu0 %v24_v26  ;;  %v53_v40 = vld [vmem:[%s537_s1 + $0x130] sm:$0xff]  ;;  %v52_v44 = vld [vmem:[%s537_s1 + $0x128] sm:$0xff]  ;;  %v51_v49 = vld [vmem:[%s537_s1 + $0x120] sm:$0xff] }
  0x11   :  { %294 = vmatpush3.msra.mxu1 %v56_v27  ;;  %260 = vmatprep.subr.mxu0 %v39_v28  ;;  %v34_v50 = vld [vmem:[%s537_s1 + $0x98] sm:$0xff]  ;;  %v33_v54 = vld [vmem:[%s537_s1 + $0x90] sm:$0xff]  ;;  %v14_v59 = vld [vmem:[%s538_s0] sm:$0xf] }
  0x12   :  { %295 = vmatprep.subr.mxu1 %v71_v29  ;;  %261 = vmatpush3.msra.mxu0 %v23_v30  ;;  %v66_v51 = vld [vmem:[%s537_s1 + $0x198] sm:$0xff]  ;;  %v65_v55 = vld [vmem:[%s537_s1 + $0x190] sm:$0xff]  ;;  %v32_v61 = vld [vmem:[%s537_s1 + $0x88] sm:$0xff]  ;;  %v88_v5 = vrot.slane %v14_v59, %v87_v56  ;;  %v96_v7 = vrot.slane %v14_v59, %v95_v60  ;;  %v84_v9 = vrot.slane %v14_v59, %v83_v63 }
  0x13   :  { %296 = vmatpush3.msra.mxu1 %v55_v31  ;;  %262 = vmatprep.subr.mxu0 %v38_v32  ;;  %v18_v52 = vld [vmem:[%s537_s1 + $0x18] sm:$0xff]  ;;  %v17_v57 = vld [vmem:[%s537_s1 + $0x10] sm:$0xff]  ;;  %v64_v62 = vld [vmem:[%s537_s1 + $0x188] sm:$0xff]  ;;  %v92_v10 = vrot.slane %v14_v59, %v91_v0 }
  0x14   :  { %297 = vmatprep.subr.mxu1 %v70_v33  ;;  %263 = vmatpush3.msra.mxu0 %v22_v34  ;;  %v50_v53 = vld [vmem:[%s537_s1 + $0x118] sm:$0xff]  ;;  %v49_v58 = vld [vmem:[%s537_s1 + $0x110] sm:$0xff]  ;;  %v16_v1 = vld [vmem:[%s537_s1 + $0x8] sm:$0xff] }
  0x15   :  { %298 = vmatpush3.msra.mxu1 %v54_v35  ;;  %264 = vmatprep.subr.mxu0 %v37_v36  ;;  %v48_v2 = vld [vmem:[%s537_s1 + $0x108] sm:$0xff]  ;;  %v31_v3 = vld [vmem:[%s537_s1 + $0x80] sm:$0xff] }
  0x16   :  { %299 = vmatprep.subr.mxu1 %v69_v37  ;;  %265 = vmatpush3.msra.mxu0 %v21_v39  ;;  %v63_v4 = vld [vmem:[%s537_s1 + $0x180] sm:$0xff] }
  0x17   :  { %300 = vmatpush3.msra.mxu1 %v53_v40  ;;  %266 = vmatprep.subr.mxu0 %v36_v41  ;;  %v15_v6 = vld [vmem:[%s537_s1] sm:$0xff] }
  0x18   :  { %301 = vmatprep.subr.mxu1 %v68_v42  ;;  %267 = vmatpush3.msra.mxu0 %v20_v43  ;;  %v47_v8 = vld [vmem:[%s537_s1 + $0x100] sm:$0xff] }
  0x19   :  { %302 = vmatpush3.msra.mxu1 %v52_v44  ;;  %268 = vmatprep.subr.mxu0 %v35_v45  ;;  %v79_v13 = vld [vmem:[%s539_s2] sm:$0x1] }
  0x1a   :  { %303 = vmatprep.subr.mxu1 %v67_v46  ;;  %269 = vmatpush3.msra.mxu0 %v19_v48 }
  0x1b   :  { %304 = vmatpush3.msra.mxu1 %v51_v49  ;;  %270 = vmatprep.subr.mxu0 %v34_v50 }
  0x1c   :  { %305 = vmatprep.subr.mxu1 %v66_v51  ;;  %271 = vmatpush3.msra.mxu0 %v18_v52 }
  0x1d   :  { %306 = vmatpush3.msra.mxu1 %v50_v53  ;;  %272 = vmatprep.subr.mxu0 %v33_v54 }
  0x1e   :  { %307 = vmatprep.subr.mxu1 %v65_v55  ;;  %273 = vmatpush3.msra.mxu0 %v17_v57 }
  0x1f   :  { %308 = vmatpush3.msra.mxu1 %v49_v58  ;;  %274 = vmatprep.subr.mxu0 %v32_v61 }
  0x20   :  { %309 = vmatprep.subr.mxu1 %v64_v62  ;;  %275 = vmatpush3.msra.mxu0 %v16_v1 }
  0x21   :  { %310 = vmatpush3.msra.mxu1 %v48_v2  ;;  %276 = vmatprep.subr.mxu0 %v31_v3 }
  0x22   :  { %311 = vmatprep.subr.mxu1 %v63_v4  ;;  %277 = vmatpush3.msra.mxu0 %v15_v6 }
  0x23   :  { %165 = vmatprep.mubr.f32.mxu0 %v88_v5  ;;  %312 = vmatpush3.msra.mxu1 %v47_v8 }
  0x24   :  { %235 = vmatprep.mubr.f32.mxu1 %v96_v7  ;;  %166 = vmatmul.mubr.f32.vlgmr.msra.gmra.mxu0 %v84_v9 }
  0x25   :  { %236 = vmatmul.mubr.f32.vlgmr.msra.gmra.mxu1 %v92_v10 }
  0xe4   :  { %v278_v11 = vpop.f32.mrf.mxu0 }
  0xe5   :  { %v313_v12 = vpop.f32.mrf.mxu1 }
  0xe6   :  { %v279_v14 = vpop.f32.mrf.mxu0 }
  0xe7   :  { %v314_v15 = vpop.f32.mrf.mxu1  ;;  %v280_v16 = vadd.f32 %v279_v14, %v278_v11 }
  0xe8   :  { %v315_v18 = vadd.f32 %v314_v15, %v313_v12 }
  0xe9   :  { %v168_v17 = vadd.f32 %v280_v16, %v79_v13 }
  0xeb   :  { %v238_v19 = vadd.f32 %v315_v18, %v168_v17 }
  0xed   :  { %241 = vst [vmem:[%s540_s3] sm:$0x1] %v238_v19 }

</bundles_post_ra>
